<compile_context>
chip_gen: v7x
topology: tpu7x:2x2x1
jax: 0.10.0
libtpu: 0.0.40
codegen_flags: <defaults>
</compile_context>

<pallas_src>
import functools

import numpy as np
import jax
import jax.numpy as jnp
from jax.experimental import pallas as pl
from jax.experimental.pallas import tpu as pltpu


def _round_up(a, b):
    return ((a + b - 1) // b) * b


def _choose_tile(dim, max_tile, unit=128, waste_cap=0.10):
    """Largest tile (multiple of `unit`, <= max_tile) keeping pad waste low."""
    dim_ru = _round_up(max(dim, 1), unit)
    if dim_ru <= max_tile:
        return dim_ru                       # single tile covers the whole axis
    t = max_tile
    while t > unit:
        pad = _round_up(dim, t)
        if (pad - dim) / pad <= waste_cap:
            return t
        t -= unit
    return unit


def _gaussian_kernel(xt_ref, mu_ref, o_ref, acc_ref, *, out_scale):
    k = pl.program_id(1)

    @pl.when(k == 0)
    def _():
        acc_ref[...] = jnp.zeros_like(acc_ref)

    # One MXU contraction over the augmented K=8 axis produces
    #   arg[n, m] = -||x_m - mu_n||^2 / (2 var)
    # (coords and the scaled squared-norm terms are folded into the operands).
    arg = jax.lax.dot_general(
        mu_ref[...], xt_ref[...],
        dimension_numbers=(((0,), (0,)), ((), ())),
        preferred_element_type=jnp.float32)                 # (TN, TM)

    # Clamp tiny positive drift from the expansion, then the hot EUP exp.
    pdf = jnp.exp(jnp.minimum(arg, 0.0))                    # (TN, TM)

    # Partial component reduction with VPU adds into the (8, TM) accumulator;
    # the expensive XLU sublane reduce happens once per M tile (epilogue).
    tn_blk, tm_blk = pdf.shape
    acc_ref[...] += jnp.sum(pdf.reshape(tn_blk // 8, 8, tm_blk), axis=0)

    @pl.when(k == pl.num_programs(1) - 1)
    def _():
        # (2*pi)^{-3/2} * std^{-3} * (1/N) applied once per output element.
        o_ref[...] = jnp.sum(acc_ref[...], axis=0, keepdims=True) * out_scale


def gaussian_model_forward(x, mean_positions, variance, *, tile_m=None, tile_n=None):
    """x: (M, 3), mean_positions: (N, 3)  ->  (M,) f32 mixture pdf."""
    M, D = x.shape
    N, D2 = mean_positions.shape
    assert D == 3 and D2 == 3

    variance = float(variance)
    inv_two_var = 1.0 / (2.0 * variance)
    norm_const = 1.0 / ((2.0 * np.pi) ** 1.5 * variance ** 1.5)  # (2pi)^-1.5 std^-3
    out_scale = norm_const / N

    # Generation-aware ceilings: v5e/v6e have 128 MiB VMEM and a single
    # TensorCore; anything else is treated as v7x-like (64 MiB VMEM, 2 TCs).
    kind = ""
    try:
        kind = jax.devices()[0].device_kind.lower()
    except Exception:
        pass
    single_core_big_vmem = ("v5" in kind) or ("v6" in kind)
    if single_core_big_vmem:
        max_tm, max_tn, vmem_limit = 1024, 4096, 64 * 1024 * 1024
    else:
        max_tm, max_tn, vmem_limit = 1024, 2048, 48 * 1024 * 1024
    if tile_m is not None:
        max_tm = tile_m
    if tile_n is not None:
        max_tn = tile_n

    tm = _choose_tile(M, max_tm)
    tn = _choose_tile(N, max_tn)
    m_pad = _round_up(M, tm)
    n_pad = _round_up(N, tn)

    # On 2-TC chips make sure the 'parallel' M axis has >= 2 tiles when the
    # split costs no extra padding, so both TensorCores get work.
    if (not single_core_big_vmem) and (m_pad // tm) < 2 \
            and m_pad >= 256 and m_pad % 256 == 0:
        tm = m_pad // 2

    grid = (m_pad // tm, n_pad // tn)

    x_f = x.astype(jnp.float32)
    mu_f = mean_positions.astype(jnp.float32)

    # Center both clouds to limit cancellation in the distance expansion.
    center = jnp.mean(x_f, axis=0)
    x_c = x_f - center
    mu_c = mu_f - center

    # Augmented K=8 operands: arg = mu_aug^T @ xt_aug.
    #   xt column i : [x_i(3), 1, -inv2var*||x_i||^2, 0, 0, 0]
    #   mu column j : [2*inv2var*mu_j(3), -inv2var*||mu_j||^2, 1, 0, 0, 0]
    xt_aug = jnp.zeros((8, m_pad), jnp.float32)
    xt_aug = xt_aug.at[0:3, :M].set(x_c.T)
    xt_aug = xt_aug.at[3, :M].set(1.0)
    xt_aug = xt_aug.at[4, :M].set(-inv_two_var * jnp.sum(x_c * x_c, axis=1))

    mu_aug = jnp.zeros((8, n_pad), jnp.float32)
    mu_aug = mu_aug.at[0:3, :N].set((2.0 * inv_two_var) * mu_c.T)
    mu_aug = mu_aug.at[3, :N].set(-inv_two_var * jnp.sum(mu_c * mu_c, axis=1))
    mu_aug = mu_aug.at[4, :N].set(1.0)
    # Padded components: arg = -1e30 -> exp underflows to exactly 0.
    mu_aug = mu_aug.at[3, N:].set(-1e30)

    kernel = functools.partial(_gaussian_kernel, out_scale=float(out_scale))

    grid_m = grid[0]
    cost = pl.CostEstimate(
        flops=2 * 8 * m_pad * n_pad        # augmented-K cross matmul
              + 2 * m_pad * n_pad,         # clamp + component-sum adds
        transcendentals=m_pad * n_pad,
        # mu is re-streamed once per M tile.
        bytes_accessed=4 * (8 * m_pad + 8 * n_pad * grid_m + m_pad),
    )

    out = pl.pallas_call(
        kernel,
        out_shape=jax.ShapeDtypeStruct((1, m_pad), jnp.float32),
        grid_spec=pltpu.PrefetchScalarGridSpec(
            num_scalar_prefetch=0,
            grid=grid,
            in_specs=[
                pl.BlockSpec((8, tm), lambda i, k: (0, i)),   # x (augmented), per M tile
                pl.BlockSpec((8, tn), lambda i, k: (0, k)),   # mu (augmented), streamed over N
            ],
            out_specs=pl.BlockSpec((1, tm), lambda i, k: (0, i)),  # lane-dense row
            scratch_shapes=[pltpu.VMEM((8, tm), jnp.float32)],     # component accumulator
        ),
        compiler_params=pltpu.CompilerParams(
            dimension_semantics=("parallel", "arbitrary"),
            vmem_limit_bytes=vmem_limit,
        ),
        cost_estimate=cost,
    )(xt_aug, mu_aug)
    return out[0, :M]


def _reference(x, mu, variance):
    std = np.sqrt(variance)
    d2 = jnp.sum((x[:, None, :] - mu[None, :, :]) ** 2, axis=2)
    pdf = jnp.exp(-d2 / (2.0 * std ** 2)) / ((2.0 * np.pi) ** 1.5 * std ** 3)
    return jnp.sum(pdf * (1.0 / mu.shape[0]), axis=1)


if __name__ == "__main__":
    key = jax.random.PRNGKey(0)
    k1, k2 = jax.random.split(key)

    N = 8            # number of Gaussian components
    M = 16           # number of query points
    variance = 0.5

    # deterministic parameter init (stand-in for torch.randn(N, 3) initial guess)
    mean_positions = jax.random.normal(k1, (N, 3), dtype=jnp.float32)
    x = jax.random.normal(k2, (M, 3), dtype=jnp.float32)

    out = gaussian_model_forward(x, mean_positions, variance)
    out = jax.block_until_ready(out)

    ref = _reference(x, mean_positions, variance)
    np.testing.assert_allclose(np.asarray(out), np.asarray(ref), rtol=2e-5, atol=2e-6)

    print("KERNEL_OK")
</pallas_src>

<mosaic_0001>
module attributes {stable_mosaic.version = 11 : i64} {
  func.func @_gaussian_kernel(%arg0: i32, %arg1: i32, %arg2: memref<8x128xf32, #tpu.memory_space<vmem>>, %arg3: memref<8x128xf32, #tpu.memory_space<vmem>>, %arg4: memref<1x128xf32, #tpu.memory_space<vmem>>, %arg5: memref<8x128xf32, #tpu.memory_space<vmem>>) attributes {dimension_semantics = [#tpu.dimension_semantics<parallel>, #tpu.dimension_semantics<arbitrary>], iteration_bounds = array<i64: 1, 1>, scalar_prefetch = 0 : i64, scratch_operands = 1 : i64, tpu.core_type = #tpu.core_type<tc>, window_params = [{transform_indices = @transform_0, window_bounds = array<i64: 8, 128>}, {transform_indices = @transform_1, window_bounds = array<i64: 8, 128>}, {transform_indices = @transform_2, window_bounds = array<i64: 1, 128>}]} {
    %c0_i32 = arith.constant 0 : i32
    %0 = arith.cmpi eq, %arg1, %c0_i32 : i32
    %1 = arith.extui %0 : i1 to i32
    %c0_i32_0 = arith.constant 0 : i32
    %2 = arith.cmpi ne, %1, %c0_i32_0 : i32
    scf.if %2 {
      %cst_12 = arith.constant 0.000000e+00 : f32
      %17 = vector.broadcast %cst_12 : f32 to vector<8x128xf32>
      %c0_13 = arith.constant 0 : index
      %c0_14 = arith.constant 0 : index
      %18 = vector.load %arg5[%c0_13, %c0_14] : memref<8x128xf32, #tpu.memory_space<vmem>>, vector<8x128xf32>
      tpu.vector_store %arg5[%c0_13, %c0_14], %17 {strides = array<i32>} : memref<8x128xf32, #tpu.memory_space<vmem>>, vector<8x128xf32>,
    } else {
    }
    %c0 = arith.constant 0 : index
    %c0_1 = arith.constant 0 : index
    %3 = vector.load %arg3[%c0, %c0_1] : memref<8x128xf32, #tpu.memory_space<vmem>>, vector<8x128xf32>
    %c0_2 = arith.constant 0 : index
    %c0_3 = arith.constant 0 : index
    %4 = vector.load %arg2[%c0_2, %c0_3] : memref<8x128xf32, #tpu.memory_space<vmem>>, vector<8x128xf32>
    %cst = arith.constant dense<0.000000e+00> : vector<128x128xf32>
    %5 = tpu.matmul %3, %4, %cst {dimension_numbers = #tpu.dot_dimension_numbers<[0], [0], [1], [1], [0, 1, 1, 1], [], []>} : vector<8x128xf32>, vector<8x128xf32>, vector<128x128xf32> -> vector<128x128xf32>
    %cst_4 = arith.constant 0.000000e+00 : f32
    %6 = vector.broadcast %cst_4 : f32 to vector<128x128xf32>
    %7 = arith.minimumf %5, %6 : vector<128x128xf32>
    %8 = math.exp %7 : vector<128x128xf32>
    %c0_5 = arith.constant 0 : index
    %c0_6 = arith.constant 0 : index
    %9 = vector.load %arg5[%c0_5, %c0_6] : memref<8x128xf32, #tpu.memory_space<vmem>>, vector<8x128xf32>
    %10 = vector.shape_cast %8 : vector<128x128xf32> to vector<16x8x128xf32>
    %cst_7 = arith.constant dense<0.000000e+00> : vector<8x128xf32>
    %11 = vector.multi_reduction <add>, %10, %cst_7 [0] : vector<16x8x128xf32> to vector<8x128xf32>
    %12 = arith.addf %9, %11 : vector<8x128xf32>
    %c0_8 = arith.constant 0 : index
    %c0_9 = arith.constant 0 : index
    %13 = vector.load %arg5[%c0_8, %c0_9] : memref<8x128xf32, #tpu.memory_space<vmem>>, vector<8x128xf32>
    tpu.vector_store %arg5[%c0_8, %c0_9], %12 {strides = array<i32>} : memref<8x128xf32, #tpu.memory_space<vmem>>, vector<8x128xf32>,
    %c0_i32_10 = arith.constant 0 : i32
    %14 = arith.cmpi eq, %arg1, %c0_i32_10 : i32
    %15 = arith.extui %14 : i1 to i32
    %c0_i32_11 = arith.constant 0 : i32
    %16 = arith.cmpi ne, %15, %c0_i32_11 : i32
    scf.if %16 {
      %c0_12 = arith.constant 0 : index
      %c0_13 = arith.constant 0 : index
      %17 = vector.load %arg5[%c0_12, %c0_13] : memref<8x128xf32, #tpu.memory_space<vmem>>, vector<8x128xf32>
      %cst_14 = arith.constant dense<0.000000e+00> : vector<128xf32>
      %18 = vector.multi_reduction <add>, %17, %cst_14 [0] : vector<8x128xf32> to vector<128xf32>
      %19 = vector.shape_cast %18 : vector<128xf32> to vector<1x128xf32>
      %cst_15 = arith.constant 0.0224483907 : f32
      %20 = vector.broadcast %cst_15 : f32 to vector<1x128xf32>
      %21 = arith.mulf %19, %20 : vector<1x128xf32>
      %c0_16 = arith.constant 0 : index
      %c0_17 = arith.constant 0 : index
      %22 = vector.load %arg4[%c0_16, %c0_17] : memref<1x128xf32, #tpu.memory_space<vmem>>, vector<1x128xf32>
      tpu.vector_store %arg4[%c0_16, %c0_17], %21 {strides = array<i32>} : memref<1x128xf32, #tpu.memory_space<vmem>>, vector<1x128xf32>,
    } else {
    }
    return
  }
  func.func @transform_0(%arg0: i32, %arg1: i32) -> (i32, i32) {
    %c0_i32 = arith.constant 0 : i32
    %c0_i32_0 = arith.constant 0 : i32
    return %c0_i32, %arg0 : i32, i32
  }
  func.func @transform_1(%arg0: i32, %arg1: i32) -> (i32, i32) {
    %c0_i32 = arith.constant 0 : i32
    %c0_i32_0 = arith.constant 0 : i32
    return %c0_i32, %arg1 : i32, i32
  }
  func.func @transform_2(%arg0: i32, %arg1: i32) -> (i32, i32) {
    %c0_i32 = arith.constant 0 : i32
    %c0_i32_0 = arith.constant 0 : i32
    return %c0_i32, %arg0 : i32, i32
  }
}

</mosaic_0001>

<bundles_post_ra>
// kernel: tpu_custom_call.1
= control target key start
LH: loop header
LB: loop body
LE: loop exit
PB: predicated region body
PF: predicated region fallthrough
CT: control target
= control target key end

     0   :  { %7 = vsyncpa [#allocation4], 0  ;;  %s602_s0 = inlined_call_operand.hbm [shape: f32[8,128], index: 0, kind: input, shape index: {}]   ;;  %s603_s1 = inlined_call_operand.hbm [shape: f32[8,128], index: 1, kind: input, shape index: {}]   ;;  %s604_s2 = inlined_call_operand.hbm [shape: f32[1,128], index: 2, kind: output, shape index: {}]  }
   0x1   :  { %8 = vsyncpa [#allocation7], 0 }
   0x2   :  { %9 = vsyncpa [#allocation5], 0  ;;  %s532_s9 = smov [#allocation3]   ;;  %s533_s11 = smov [#allocation6]  }
   0x3   :  { %s16_s10 = sshll.u32 %s532_s9, 4  ;;  %s26_s12 = sshll.u32 %s533_s11, 4  ;;  %s17_s10 = int_to_ptr.vmem [resolvable:$true] %s16_s10  ;;  %s27_s12 = int_to_ptr.vmem [resolvable:$true] %s26_s12 }
   0x4   :  { %s460_s15 = scalar_lea.hbm %s602_s0, 128 }
   0x5   :  { %p461_p0 = scmp.ne.s32.totalorder %s602_s0, %s460_s15  ;;  %p464_p1 = scmp.lt.u32.totalorder %s460_s15, %s602_s0 }
   0x7   :  { %p466_p2 = pnand %p464_p1, %p461_p0 }
   0x9   :  { %469 = shalt.err (!%p466_p2)
}
   0xa   :  { %s470_s20 = scalar_lea.vmem %s17_s10, 128  ;;  %p475_p4 = scmp.lt.s32.totalorder %s17_s10, %s17_s10 }
   0xb   :  { %p471_p3 = scmp.ne.s32.totalorder %s17_s10, %s470_s20  ;;  %p476_p5 = scmp.lt.s32.totalorder %s470_s20, %s470_s20 }
   0xd   :  { %p477_p6 = por %p476_p5, %p475_p4 }
   0xf   :  { %p478_p7 = pnand %p477_p6, %p471_p3 }
  0x11   :  { %481 = shalt.err (!%p478_p7)
}
  0x12   :  { %19 = dma.hbm_to_vmem [thread:$0]  %s602_s0, 128, %s17_s10, [#allocation4]  }
  0x13   :  { %s482_s25 = scalar_lea.hbm %s603_s1, 128 }
  0x14   :  { %p483_p8 = scmp.ne.s32.totalorder %s603_s1, %s482_s25  ;;  %p486_p9 = scmp.lt.u32.totalorder %s482_s25, %s603_s1 }
  0x16   :  { %p488_p10 = pnand %p486_p9, %p483_p8 }
  0x18   :  { %491 = shalt.err (!%p488_p10)
}
  0x19   :  { %s492_s30 = scalar_lea.vmem %s27_s12, 128  ;;  %p497_p12 = scmp.lt.s32.totalorder %s27_s12, %s27_s12 }
  0x1a   :  { %p493_p11 = scmp.ne.s32.totalorder %s27_s12, %s492_s30  ;;  %p498_p13 = scmp.lt.s32.totalorder %s492_s30, %s492_s30 }
  0x1c   :  { %p499_p0 = por %p498_p13, %p497_p12 }
  0x1e   :  { %p500_p1 = pnand %p499_p0, %p493_p11 }
  0x20   :  { %503 = shalt.err (!%p500_p1)
}
  0x21   :  { %29 = dma.hbm_to_vmem [thread:$0]  %s603_s1, 128, %s27_s12, [#allocation7]  }
  0x22   :  { %526 = dma.done.wait [#allocation4], 128  }
  0x23   :  { %527 = vsyncadd [#allocation4], 4294967168 }
  0x24   :  { %528 = dma.done.wait [#allocation7], 128  }
  0x25   :  { %529 = vsyncadd [#allocation7], 4294967168  ;;  %v41_v0 = vld [vmem:[#allocation6] sm:$0xff]  ;;  %v42_v1 = vld [vmem:[#allocation3] sm:$0xff]  ;;  %vm75_vm0 = vcmask 64512   ;;  %s534_s1 = smov [#allocation8]  }
  0x26   :  { %43 = vxpose.xlu0.b32.start.end [1/1] (short) %v41_v0, 128  ;;  %396 = vmatprep.subr.mxu0 %v42_v1  ;;  %s353_s4 = sshll.u32 %s534_s1, 4  ;;  %s354_s4 = int_to_ptr.vmem [resolvable:$true] %s353_s4 }
  0x27   :  { %422 = vmatprep.subr.mxu1 %v42_v1  ;;  %397 = vmatpush3.msra.mxu0 %v42_v1  ;;  %s504_s5 = scalar_lea.vmem %s354_s4, 16  ;;  %s508_s6 = scalar_lea.vmem %s354_s4, 32 }
  0x28   :  { %423 = vmatpush3.msra.mxu1 %v42_v1  ;;  %p505_p2 = scmp.ne.s32.totalorder %s354_s4, %s504_s5  ;;  %p509_p3 = scmp.lt.s32.totalorder %s354_s4, %s354_s4 }
  0x29   :  { %p510_p4 = scmp.lt.s32.totalorder %s508_s6, %s504_s5 }
  0x2b   :  { %p511_p5 = por %p510_p4, %p509_p3 }
  0x2d   :  { %p512_p6 = pnand %p511_p5, %p505_p2 }
  0xa6   :  { %v59_v2 = vpop.trf.xlu0 }
  0xa7   :  { %398 = vmatprep.mubr.msk.f32.mxu0 %vm75_vm0, %v59_v2 }
  0xaa   :  { %v60_v3 = vpop.trf.xlu0 }
  0xab   :  { %399 = vmatmul.mubr.msk.f32.vlgmr.msra.gmra.mrb[0].mxu0 %vm75_vm0, %v60_v3 }
  0xae   :  { %v61_v4 = vpop.trf.xlu0 }
  0xaf   :  { %401 = vmatprep.mubr.msk.f32.mxu0 %vm75_vm0, %v61_v4 }
  0xb2   :  { %v62_v5 = vpop.trf.xlu0 }
  0xb3   :  { %402 = vmatmul.mubr.msk.f32.gmra.mrb[2].mxu0 %vm75_vm0, %v62_v5 }
  0xb6   :  { %v63_v6 = vpop.trf.xlu0 }
  0xb7   :  { %404 = vmatprep.mubr.msk.f32.mxu0 %vm75_vm0, %v63_v6 }
  0xba   :  { %v64_v7 = vpop.trf.xlu0 }
  0xbb   :  { %405 = vmatmul.mubr.msk.f32.gmra.mrb[4].mxu0 %vm75_vm0, %v64_v7 }
  0xbe   :  { %v65_v8 = vpop.trf.xlu0 }
  0xbf   :  { %407 = vmatprep.mubr.msk.f32.mxu0 %vm75_vm0, %v65_v8 }
  0xc2   :  { %v66_v9 = vpop.trf.xlu0 }
  0xc3   :  { %408 = vmatmul.mubr.msk.f32.gmra.mrb[6].mxu0 %vm75_vm0, %v66_v9 }
  0xc6   :  { %v67_v10 = vpop.trf.xlu0 }
  0xc7   :  { %410 = vmatprep.mubr.msk.f32.mxu1 %vm75_vm0, %v67_v10 }
  0xca   :  { %v68_v11 = vpop.trf.xlu0 }
  0xcb   :  { %411 = vmatmul.mubr.msk.f32.vlgmr.msra.gmra.mrb[0].mxu1 %vm75_vm0, %v68_v11 }
  0xce   :  { %v69_v12 = vpop.trf.xlu0 }
  0xcf   :  { %413 = vmatprep.mubr.msk.f32.mxu1 %vm75_vm0, %v69_v12 }
  0xd2   :  { %v70_v13 = vpop.trf.xlu0 }
  0xd3   :  { %414 = vmatmul.mubr.msk.f32.gmra.mrb[2].mxu1 %vm75_vm0, %v70_v13 }
  0xd6   :  { %v71_v14 = vpop.trf.xlu0 }
  0xd7   :  { %416 = vmatprep.mubr.msk.f32.mxu1 %vm75_vm0, %v71_v14 }
  0xda   :  { %v72_v15 = vpop.trf.xlu0 }
  0xdb   :  { %417 = vmatmul.mubr.msk.f32.gmra.mrb[4].mxu1 %vm75_vm0, %v72_v15 }
  0xde   :  { %v73_v16 = vpop.trf.xlu0 }
  0xdf   :  { %419 = vmatprep.mubr.msk.f32.mxu1 %vm75_vm0, %v73_v16 }
  0xe2   :  { %v74_v17 = vpop.trf.xlu0 }
  0xe3   :  { %420 = vmatmul.mubr.msk.f32.gmra.mrb[6].mxu1 %vm75_vm0, %v74_v17 }
 0x17e   :  { %v400_v18 = vpop.f32.mrb[0].mxu0 }
 0x17f   :  { %v270_v19 = vmin.f32 %v400_v18, 0.0  ;;  %v190_v20 = vpop.f32.mrb[1].mxu0 }
 0x180   :  { %v269_v21 = vmin.f32 %v190_v20, 0.0 }
 0x181   :  { %v287_v22 = vmul.f32 1.442695, %v270_v19 }
 0x182   :  { %v285_v23 = vmul.f32 1.442695, %v269_v21 }
 0x183   :  { %428 = vpow2.f32 %v287_v22 }
 0x184   :  { %430 = vpow2.f32 %v285_v23 }
 0x186   :  { %v403_v24 = vpop.f32.mrb[2].mxu0 }
 0x187   :  { %v272_v25 = vmin.f32 %v403_v24, 0.0  ;;  %v200_v26 = vpop.f32.mrb[3].mxu0 }
 0x188   :  { %v271_v27 = vmin.f32 %v200_v26, 0.0 }
 0x189   :  { %v291_v28 = vmul.f32 1.442695, %v272_v25 }
 0x18a   :  { %v289_v29 = vmul.f32 1.442695, %v271_v27 }
 0x18c   :  { %432 = vpow2.f32 %v289_v29 }
 0x18d   :  { %v429_v30 = vpop.eup %428  ;;  %434 = vpow2.f32 %v291_v28 }
 0x18e   :  { %v431_v31 = vpop.eup %430  ;;  %v406_v32 = vpop.f32.mrb[4].mxu0 }
 0x18f   :  { %v318_v33 = vadd.f32 %v431_v31, %v429_v30  ;;  %v274_v34 = vmin.f32 %v406_v32, 0.0  ;;  %v210_v35 = vpop.f32.mrb[5].mxu0 }
 0x190   :  { %v273_v36 = vmin.f32 %v210_v35, 0.0 }
 0x191   :  { %v295_v37 = vmul.f32 1.442695, %v274_v34 }
 0x192   :  { %v293_v38 = vmul.f32 1.442695, %v273_v36 }
 0x194   :  { %436 = vpow2.f32 %v293_v38 }
 0x195   :  { %438 = vpow2.f32 %v295_v37 }
 0x196   :  { %v433_v39 = vpop.eup %432  ;;  %v409_v40 = vpop.f32.mrb[6].mxu0 }
 0x197   :  { %v319_v41 = vadd.f32 %v433_v39, %v318_v33  ;;  %v276_v42 = vmin.f32 %v409_v40, 0.0  ;;  %v220_v43 = vpop.f32.mrb[7].mxu0  ;;  %v435_v44 = vpop.eup %434 }
 0x198   :  { %v275_v45 = vmin.f32 %v220_v43, 0.0 }
 0x199   :  { %v320_v46 = vadd.f32 %v435_v44, %v319_v41  ;;  %v299_v47 = vmul.f32 1.442695, %v276_v42 }
 0x19a   :  { %v297_v48 = vmul.f32 1.442695, %v275_v45 }
 0x19c   :  { %440 = vpow2.f32 %v297_v48 }
 0x19d   :  { %442 = vpow2.f32 %v299_v47 }
 0x19e   :  { %v437_v49 = vpop.eup %436  ;;  %v412_v50 = vpop.f32.mrb[0].mxu1 }
 0x19f   :  { %v321_v51 = vadd.f32 %v437_v49, %v320_v46  ;;  %v278_v52 = vmin.f32 %v412_v50, 0.0  ;;  %v230_v53 = vpop.f32.mrb[1].mxu1  ;;  %v439_v54 = vpop.eup %438 }
 0x1a0   :  { %v277_v55 = vmin.f32 %v230_v53, 0.0 }
 0x1a1   :  { %v322_v56 = vadd.f32 %v439_v54, %v321_v51  ;;  %v303_v57 = vmul.f32 1.442695, %v278_v52 }
 0x1a2   :  { %v301_v58 = vmul.f32 1.442695, %v277_v55 }
 0x1a4   :  { %444 = vpow2.f32 %v301_v58 }
 0x1a5   :  { %446 = vpow2.f32 %v303_v57 }
 0x1a6   :  { %v441_v59 = vpop.eup %440  ;;  %v415_v60 = vpop.f32.mrb[2].mxu1 }
 0x1a7   :  { %v323_v61 = vadd.f32 %v441_v59, %v322_v56  ;;  %v280_v62 = vmin.f32 %v415_v60, 0.0  ;;  %v240_v63 = vpop.f32.mrb[3].mxu1  ;;  %v443_v0 = vpop.eup %442 }
 0x1a8   :  { %v279_v1 = vmin.f32 %v240_v63, 0.0 }
 0x1a9   :  { %v324_v2 = vadd.f32 %v443_v0, %v323_v61  ;;  %v307_v3 = vmul.f32 1.442695, %v280_v62 }
 0x1aa   :  { %v305_v4 = vmul.f32 1.442695, %v279_v1 }
 0x1ac   :  { %448 = vpow2.f32 %v305_v4 }
 0x1ad   :  { %450 = vpow2.f32 %v307_v3 }
 0x1ae   :  { %v445_v5 = vpop.eup %444  ;;  %v418_v6 = vpop.f32.mrb[4].mxu1 }
 0x1af   :  { %v325_v7 = vadd.f32 %v445_v5, %v324_v2  ;;  %v282_v8 = vmin.f32 %v418_v6, 0.0  ;;  %v250_v9 = vpop.f32.mrb[5].mxu1  ;;  %v447_v10 = vpop.eup %446 }
 0x1b0   :  { %v281_v11 = vmin.f32 %v250_v9, 0.0 }
 0x1b1   :  { %v326_v12 = vadd.f32 %v447_v10, %v325_v7  ;;  %v311_v13 = vmul.f32 1.442695, %v282_v8 }
 0x1b2   :  { %v309_v14 = vmul.f32 1.442695, %v281_v11 }
 0x1b4   :  { %452 = vpow2.f32 %v309_v14 }
 0x1b5   :  { %454 = vpow2.f32 %v311_v13 }
 0x1b6   :  { %v449_v15 = vpop.eup %448  ;;  %v421_v16 = vpop.f32.mrb[6].mxu1 }
 0x1b7   :  { %v327_v17 = vadd.f32 %v449_v15, %v326_v12  ;;  %v284_v18 = vmin.f32 %v421_v16, 0.0  ;;  %v260_v19 = vpop.f32.mrb[7].mxu1  ;;  %v451_v20 = vpop.eup %450 }
 0x1b8   :  { %v283_v21 = vmin.f32 %v260_v19, 0.0 }
 0x1b9   :  { %v328_v22 = vadd.f32 %v451_v20, %v327_v17  ;;  %v315_v23 = vmul.f32 1.442695, %v284_v18 }
 0x1ba   :  { %v313_v24 = vmul.f32 1.442695, %v283_v21 }
 0x1bc   :  { %456 = vpow2.f32 %v313_v24 }
 0x1bd   :  { %458 = vpow2.f32 %v315_v23 }
 0x1be   :  { %v453_v25 = vpop.eup %452 }
 0x1bf   :  { %v329_v26 = vadd.f32 %v453_v25, %v328_v22  ;;  %v455_v27 = vpop.eup %454 }
 0x1c1   :  { %v330_v28 = vadd.f32 %v455_v27, %v329_v26 }
 0x1c6   :  { %v457_v29 = vpop.eup %456 }
 0x1c7   :  { %v331_v30 = vadd.f32 %v457_v29, %v330_v28  ;;  %v459_v31 = vpop.eup %458 }
 0x1c9   :  { %v332_v32 = vadd.f32 %v459_v31, %v331_v30 }
 0x1cb   :  { %v339_v33 = vrot.slane %v332_v32, 4 }
 0x1cd   :  { %v340_v34 = vadd.f32 %v339_v33, %v332_v32 }
 0x1cf   :  { %v341_v35 = vrot.slane %v340_v34, 2 }
 0x1d1   :  { %v342_v36 = vadd.f32 %v341_v35, %v340_v34 }
 0x1d3   :  { %v343_v37 = vrot.slane %v342_v36, 1 }
 0x1d5   :  { %v344_v38 = vadd.f32 %v343_v37, %v342_v36 }
 0x1d7   :  { %v345_v39 = vmul.f32 0.02244839, %v344_v38 }
 0x1d9   :  { %346 = vst [vmem:[#allocation8] sm:$0x1] %v345_v39 }
 0x1da   :  { %515 = shalt.err (!%p512_p6)
}
 0x1db   :  { %s516_s9 = scalar_lea.hbm %s604_s2, 16 }
 0x1dc   :  { %p517_p7 = scmp.ne.s32.totalorder %s604_s2, %s516_s9  ;;  %p520_p8 = scmp.lt.u32.totalorder %s516_s9, %s604_s2 }
 0x1de   :  { %p522_p9 = pnand %p520_p8, %p517_p7 }
 0x1e0   :  { %525 = shalt.err (!%p522_p9)
}
 0x1e1   :  { %356 = dma.vmem_to_hbm [thread:$0]  %s354_s4, 16, %s604_s2, [#allocation5]  }
 0x1e2   :  { %530 = dma.done.wait [#allocation5], 16  }
 0x1e3   :  { %531 = vsyncadd [#allocation5], 4294967280 }
 0x1e4   :  { %360 = vsyncpa [#allocation4], 1 }
 0x1e5   :  { %361 = vsyncpa [#allocation7], 1 }
 0x1e6   :  { %362 = vsyncpa [#allocation5], 1 }

</bundles_post_ra>
